<compile_context>
chip_gen: v7x
topology: tpu7x:2x2x1
jax: 0.10.0
libtpu: 0.0.40
codegen_flags: <defaults>
</compile_context>

<pallas_src>
import jax
import jax.numpy as jnp
from jax.experimental import pallas as pl
from jax.experimental.pallas import tpu as pltpu

_LANE = 128  # lane-dense padding target for the final projection


# ------------------------------ fused kernel -------------------------------- #

def _make_decoder_kernel(n_layers, hidden_size):
    H = hidden_size

    def kernel(*refs):
        tok_ref, emb_ref = refs[0], refs[1]
        w_refs = refs[2:2 + n_layers]                       # (in_dim+H, 4H) each
        b_refs = refs[2 + n_layers:2 + 2 * n_layers]        # (1, 4H) each
        wfc_ref, bfc_ref, h0_ref, c0_ref = refs[2 + 2 * n_layers:2 + 2 * n_layers + 4]
        pred_ref, hn_ref, cn_ref = refs[2 + 2 * n_layers + 4:]

        B = tok_ref.shape[0]
        V = emb_ref.shape[0]

        # Embedding lookup as a one-hot matmul against the VMEM-resident table.
        # Gather-free / MXU-friendly; exact because rows are 0/1.
        tok = tok_ref[...]                                              # (B, 1) int32
        onehot = (tok == jax.lax.broadcasted_iota(jnp.int32, (B, V), 1)
                  ).astype(jnp.float32)                                 # (B, V)
        x = jnp.dot(onehot, emb_ref[...],
                    preferred_element_type=jnp.float32)                 # (B, E)
        # nn.Dropout in eval mode -> identity.

        # Unrolled layer loop (n_layers is small and static; weight shapes differ
        # between layer 0 and the rest, so per-layer refs + Python unroll).
        for layer in range(n_layers):
            h_prev = h0_ref[layer]                                      # (B, H)
            c_prev = c0_ref[layer]                                      # (B, H)
            xh = jnp.concatenate([x, h_prev], axis=-1)                  # (B, in+H)
            gates = (jnp.dot(xh, w_refs[layer][...],
                             preferred_element_type=jnp.float32)
                     + b_refs[layer][...])                              # (B, 4H)
            # PyTorch gate order: i, f, g, o. Full-width nonlinearity, then slice.
            sig = jax.nn.sigmoid(gates)
            tnh = jnp.tanh(gates)
            i_g = sig[:, 0 * H:1 * H]
            f_g = sig[:, 1 * H:2 * H]
            g_g = tnh[:, 2 * H:3 * H]
            o_g = sig[:, 3 * H:4 * H]
            c_new = f_g * c_prev + i_g * g_g
            h_new = o_g * jnp.tanh(c_new)
            hn_ref[layer] = h_new
            cn_ref[layer] = c_new
            x = h_new                       # inter-layer dropout: identity (eval)

        # Final projection onto the lane-padded (128-wide) output block.
        pred_ref[...] = (jnp.dot(x, wfc_ref[...],
                                 preferred_element_type=jnp.float32)
                         + bfc_ref[...])

    return kernel


# ------------------------------ python wrapper ------------------------------- #

def decoder_forward(params, tokens, encoder_state, n_layers, output_size):
    """
    tokens: (B,) int32 token ids
    encoder_state: (h0, c0), each (n_layers, B, H)
    returns: prediction (B, output_size), (h_n, c_n) each (n_layers, B, H)
    """
    h0, c0 = encoder_state
    B = tokens.shape[0]
    H = h0.shape[-1]
    o_pad = params["w_fc_t_pad"].shape[1]

    inputs = [tokens.reshape(B, 1).astype(jnp.int32), params["embedding"]]
    inputs += [params[f"w_{l}"] for l in range(n_layers)]
    inputs += [params[f"b_{l}"] for l in range(n_layers)]
    inputs += [params["w_fc_t_pad"], params["b_fc_pad"], h0, c0]

    vmem = pl.BlockSpec(memory_space=pltpu.MemorySpace.VMEM)
    pred_pad, h_n, c_n = pl.pallas_call(
        _make_decoder_kernel(n_layers, H),
        out_shape=(jax.ShapeDtypeStruct((B, o_pad), jnp.float32),
                   jax.ShapeDtypeStruct((n_layers, B, H), jnp.float32),
                   jax.ShapeDtypeStruct((n_layers, B, H), jnp.float32)),
        in_specs=[vmem] * len(inputs),
        out_specs=(vmem, vmem, vmem),
    )(*inputs)

    return pred_pad[:, :output_size], (h_n, c_n)


# ------------------------------- param init ---------------------------------- #

def init_decoder_params(key, input_size, embedding_size, hidden_size,
                        output_size, n_layers):
    """Deterministic synthetic init mirroring the nn.Module __init__ shapes,
    pre-packed for the fused kernel."""
    params = {}
    k = key
    k, sub = jax.random.split(k)
    params["embedding"] = jax.random.normal(
        sub, (input_size, embedding_size), jnp.float32)       # nn.Embedding weight

    bound = 1.0 / jnp.sqrt(hidden_size)
    for layer in range(n_layers):
        in_dim = embedding_size if layer == 0 else hidden_size
        k, k1, k2, k3, k4 = jax.random.split(k, 5)
        w_ih = jax.random.uniform(k1, (4 * hidden_size, in_dim),
                                  jnp.float32, -bound, bound)
        w_hh = jax.random.uniform(k2, (4 * hidden_size, hidden_size),
                                  jnp.float32, -bound, bound)
        b_ih = jax.random.uniform(k3, (4 * hidden_size,), jnp.float32,
                                  -bound, bound)
        b_hh = jax.random.uniform(k4, (4 * hidden_size,), jnp.float32,
                                  -bound, bound)
        # One fused weight: gates = [x, h] @ W + b.
        params[f"w_{layer}"] = jnp.concatenate([w_ih.T, w_hh.T], axis=0)  # (in+H, 4H)
        params[f"b_{layer}"] = (b_ih + b_hh)[None, :]                      # (1, 4H)

    k, k1, k2 = jax.random.split(k, 3)
    fc_bound = 1.0 / jnp.sqrt(hidden_size)
    w_fc = jax.random.uniform(k1, (output_size, hidden_size), jnp.float32,
                              -fc_bound, fc_bound)
    b_fc = jax.random.uniform(k2, (output_size,), jnp.float32,
                              -fc_bound, fc_bound)
    # Zero-pad the projection to a lane-dense 128-wide output block.
    o_pad = ((output_size + _LANE - 1) // _LANE) * _LANE
    params["w_fc_t_pad"] = jnp.zeros((hidden_size, o_pad), jnp.float32
                                     ).at[:, :output_size].set(w_fc.T)
    params["b_fc_pad"] = jnp.zeros((1, o_pad), jnp.float32
                                   ).at[:, :output_size].set(b_fc)
    return params


# ----------------------------- pure-JAX reference ---------------------------- #

def decoder_reference(params, tokens, encoder_state, n_layers, output_size):
    h0, c0 = encoder_state
    H = h0.shape[-1]
    hi = jax.lax.Precision.HIGHEST
    x = params["embedding"][tokens]
    h_list, c_list = [], []
    for layer in range(n_layers):
        xh = jnp.concatenate([x, h0[layer]], axis=-1)
        gates = jnp.dot(xh, params[f"w_{layer}"], precision=hi) + params[f"b_{layer}"]
        i_g = jax.nn.sigmoid(gates[:, 0 * H:1 * H])
        f_g = jax.nn.sigmoid(gates[:, 1 * H:2 * H])
        g_g = jnp.tanh(gates[:, 2 * H:3 * H])
        o_g = jax.nn.sigmoid(gates[:, 3 * H:4 * H])
        c_new = f_g * c0[layer] + i_g * g_g
        h_new = o_g * jnp.tanh(c_new)
        h_list.append(h_new)
        c_list.append(c_new)
        x = h_new
    pred = (jnp.dot(x, params["w_fc_t_pad"][:, :output_size], precision=hi)
            + params["b_fc_pad"][0, :output_size])
    return pred, (jnp.stack(h_list), jnp.stack(c_list))


# ----------------------------------- main ------------------------------------ #

if __name__ == "__main__":
    INPUT_SIZE = 16       # vocab size
    EMBEDDING_SIZE = 32
    HIDDEN_SIZE = 32
    OUTPUT_SIZE = 16
    N_LAYERS = 2
    BATCH = 8

    key = jax.random.PRNGKey(0)
    key, kp, kt, kh, kc = jax.random.split(key, 5)

    params = init_decoder_params(kp, INPUT_SIZE, EMBEDDING_SIZE, HIDDEN_SIZE,
                                 OUTPUT_SIZE, N_LAYERS)

    tokens = jax.random.randint(kt, (BATCH,), 0, INPUT_SIZE, dtype=jnp.int32)
    h0 = jax.random.normal(kh, (N_LAYERS, BATCH, HIDDEN_SIZE), jnp.float32)
    c0 = jax.random.normal(kc, (N_LAYERS, BATCH, HIDDEN_SIZE), jnp.float32)

    prediction, (h_n, c_n) = decoder_forward(
        params, tokens, (h0, c0), N_LAYERS, OUTPUT_SIZE)
    jax.block_until_ready((prediction, h_n, c_n))

    assert prediction.shape == (BATCH, OUTPUT_SIZE)
    assert h_n.shape == (N_LAYERS, BATCH, HIDDEN_SIZE)
    assert c_n.shape == (N_LAYERS, BATCH, HIDDEN_SIZE)

    # Correctness check against a pure-JAX reference.
    pred_ref, (h_ref, c_ref) = decoder_reference(
        params, tokens, (h0, c0), N_LAYERS, OUTPUT_SIZE)
    assert jnp.allclose(prediction, pred_ref, atol=1e-3, rtol=1e-3)
    assert jnp.allclose(h_n, h_ref, atol=1e-3, rtol=1e-3)
    assert jnp.allclose(c_n, c_ref, atol=1e-3, rtol=1e-3)

    print("KERNEL_OK")
</pallas_src>

<mosaic_0001>
module attributes {stable_mosaic.version = 11 : i64} {
  func.func @kernel(%arg0: memref<8x1xi32, #tpu.memory_space<vmem>>, %arg1: memref<16x32xf32, #tpu.memory_space<vmem>>, %arg2: memref<64x128xf32, #tpu.memory_space<vmem>>, %arg3: memref<64x128xf32, #tpu.memory_space<vmem>>, %arg4: memref<1x128xf32, #tpu.memory_space<vmem>>, %arg5: memref<1x128xf32, #tpu.memory_space<vmem>>, %arg6: memref<32x128xf32, #tpu.memory_space<vmem>>, %arg7: memref<1x128xf32, #tpu.memory_space<vmem>>, %arg8: memref<2x8x32xf32, #tpu.memory_space<vmem>>, %arg9: memref<2x8x32xf32, #tpu.memory_space<vmem>>, %arg10: memref<8x128xf32, #tpu.memory_space<vmem>>, %arg11: memref<2x8x32xf32, #tpu.memory_space<vmem>>, %arg12: memref<2x8x32xf32, #tpu.memory_space<vmem>>) attributes {dimension_semantics = [], scalar_prefetch = 0 : i64, scratch_operands = 0 : i64, tpu.core_type = #tpu.core_type<tc>} {
    %c0 = arith.constant 0 : index
    %c0_0 = arith.constant 0 : index
    %0 = vector.load %arg0[%c0, %c0_0] : memref<8x1xi32, #tpu.memory_space<vmem>>, vector<8x1xi32>
    %1 = tpu.iota {dimensions = array<i32: 1>} : vector<8x16xi32>
    %2 = vector.broadcast %0 : vector<8x1xi32> to vector<8x16xi32>
    %3 = arith.cmpi eq, %2, %1 : vector<8x16xi32>
    %4 = arith.extui %3 : vector<8x16xi1> to vector<8x16xi32>
    %5 = arith.sitofp %4 : vector<8x16xi32> to vector<8x16xf32>
    %c0_1 = arith.constant 0 : index
    %c0_2 = arith.constant 0 : index
    %6 = vector.load %arg1[%c0_1, %c0_2] : memref<16x32xf32, #tpu.memory_space<vmem>>, vector<16x32xf32>
    %cst = arith.constant dense<0.000000e+00> : vector<8x32xf32>
    %7 = tpu.matmul %5, %6, %cst {dimension_numbers = #tpu.dot_dimension_numbers<[1], [0], [0], [1], [0, 0, 1, 1], [], []>} : vector<8x16xf32>, vector<16x32xf32>, vector<8x32xf32> -> vector<8x32xf32>
    %c0_3 = arith.constant 0 : index
    %c0_4 = arith.constant 0 : index
    %c0_5 = arith.constant 0 : index
    %8 = vector.load %arg8[%c0_3, %c0_4, %c0_5] : memref<2x8x32xf32, #tpu.memory_space<vmem>>, vector<1x8x32xf32>
    %9 = vector.shape_cast %8 : vector<1x8x32xf32> to vector<8x32xf32>
    %c0_6 = arith.constant 0 : index
    %c0_7 = arith.constant 0 : index
    %c0_8 = arith.constant 0 : index
    %10 = vector.load %arg9[%c0_6, %c0_7, %c0_8] : memref<2x8x32xf32, #tpu.memory_space<vmem>>, vector<1x8x32xf32>
    %11 = vector.shape_cast %10 : vector<1x8x32xf32> to vector<8x32xf32>
    %12 = tpu.concatenate %7, %9 in 1 : vector<8x32xf32>, vector<8x32xf32> -> vector<8x64xf32>
    %c0_9 = arith.constant 0 : index
    %c0_10 = arith.constant 0 : index
    %13 = vector.load %arg2[%c0_9, %c0_10] : memref<64x128xf32, #tpu.memory_space<vmem>>, vector<64x128xf32>
    %cst_11 = arith.constant dense<0.000000e+00> : vector<8x128xf32>
    %14 = tpu.matmul %12, %13, %cst_11 {dimension_numbers = #tpu.dot_dimension_numbers<[1], [0], [0], [1], [0, 0, 1, 1], [], []>} : vector<8x64xf32>, vector<64x128xf32>, vector<8x128xf32> -> vector<8x128xf32>
    %c0_12 = arith.constant 0 : index
    %c0_13 = arith.constant 0 : index
    %15 = vector.load %arg4[%c0_12, %c0_13] : memref<1x128xf32, #tpu.memory_space<vmem>>, vector<1x128xf32>
    %16 = vector.broadcast %15 : vector<1x128xf32> to vector<8x128xf32>
    %17 = arith.addf %14, %16 : vector<8x128xf32>
    %18 = arith.negf %17 : vector<8x128xf32>
    %19 = math.exp %18 : vector<8x128xf32>
    %cst_14 = arith.constant 1.000000e+00 : f32
    %20 = vector.broadcast %cst_14 : f32 to vector<8x128xf32>
    %21 = arith.addf %20, %19 : vector<8x128xf32>
    %22 = arith.divf %20, %21 : vector<8x128xf32>
    %23 = math.tanh %17 : vector<8x128xf32>
    %24 = vector.extract_strided_slice %22 {offsets = [0, 0], sizes = [8, 32], strides = [1, 1]} : vector<8x128xf32> to vector<8x32xf32>
    %25 = vector.extract_strided_slice %22 {offsets = [0, 32], sizes = [8, 32], strides = [1, 1]} : vector<8x128xf32> to vector<8x32xf32>
    %26 = vector.extract_strided_slice %23 {offsets = [0, 64], sizes = [8, 32], strides = [1, 1]} : vector<8x128xf32> to vector<8x32xf32>
    %27 = vector.extract_strided_slice %22 {offsets = [0, 96], sizes = [8, 32], strides = [1, 1]} : vector<8x128xf32> to vector<8x32xf32>
    %28 = arith.mulf %25, %11 : vector<8x32xf32>
    %29 = arith.mulf %24, %26 : vector<8x32xf32>
    %30 = arith.addf %28, %29 : vector<8x32xf32>
    %31 = math.tanh %30 : vector<8x32xf32>
    %32 = arith.mulf %27, %31 : vector<8x32xf32>
    %c0_15 = arith.constant 0 : index
    %c0_16 = arith.constant 0 : index
    %c0_17 = arith.constant 0 : index
    %33 = vector.load %arg11[%c0_15, %c0_16, %c0_17] : memref<2x8x32xf32, #tpu.memory_space<vmem>>, vector<1x8x32xf32>
    %34 = vector.shape_cast %33 : vector<1x8x32xf32> to vector<8x32xf32>
    %35 = vector.shape_cast %32 : vector<8x32xf32> to vector<1x8x32xf32>
    tpu.vector_store %arg11[%c0_15, %c0_16, %c0_17], %35 {strides = array<i32>} : memref<2x8x32xf32, #tpu.memory_space<vmem>>, vector<1x8x32xf32>,
    %c0_18 = arith.constant 0 : index
    %c0_19 = arith.constant 0 : index
    %c0_20 = arith.constant 0 : index
    %36 = vector.load %arg12[%c0_18, %c0_19, %c0_20] : memref<2x8x32xf32, #tpu.memory_space<vmem>>, vector<1x8x32xf32>
    %37 = vector.shape_cast %36 : vector<1x8x32xf32> to vector<8x32xf32>
    %38 = vector.shape_cast %30 : vector<8x32xf32> to vector<1x8x32xf32>
    tpu.vector_store %arg12[%c0_18, %c0_19, %c0_20], %38 {strides = array<i32>} : memref<2x8x32xf32, #tpu.memory_space<vmem>>, vector<1x8x32xf32>,
    %c1 = arith.constant 1 : index
    %c0_21 = arith.constant 0 : index
    %c0_22 = arith.constant 0 : index
    %39 = vector.load %arg8[%c1, %c0_21, %c0_22] : memref<2x8x32xf32, #tpu.memory_space<vmem>>, vector<1x8x32xf32>
    %40 = vector.shape_cast %39 : vector<1x8x32xf32> to vector<8x32xf32>
    %c1_23 = arith.constant 1 : index
    %c0_24 = arith.constant 0 : index
    %c0_25 = arith.constant 0 : index
    %41 = vector.load %arg9[%c1_23, %c0_24, %c0_25] : memref<2x8x32xf32, #tpu.memory_space<vmem>>, vector<1x8x32xf32>
    %42 = vector.shape_cast %41 : vector<1x8x32xf32> to vector<8x32xf32>
    %43 = tpu.concatenate %32, %40 in 1 : vector<8x32xf32>, vector<8x32xf32> -> vector<8x64xf32>
    %c0_26 = arith.constant 0 : index
    %c0_27 = arith.constant 0 : index
    %44 = vector.load %arg3[%c0_26, %c0_27] : memref<64x128xf32, #tpu.memory_space<vmem>>, vector<64x128xf32>
    %cst_28 = arith.constant dense<0.000000e+00> : vector<8x128xf32>
    %45 = tpu.matmul %43, %44, %cst_28 {dimension_numbers = #tpu.dot_dimension_numbers<[1], [0], [0], [1], [0, 0, 1, 1], [], []>} : vector<8x64xf32>, vector<64x128xf32>, vector<8x128xf32> -> vector<8x128xf32>
    %c0_29 = arith.constant 0 : index
    %c0_30 = arith.constant 0 : index
    %46 = vector.load %arg5[%c0_29, %c0_30] : memref<1x128xf32, #tpu.memory_space<vmem>>, vector<1x128xf32>
    %47 = vector.broadcast %46 : vector<1x128xf32> to vector<8x128xf32>
    %48 = arith.addf %45, %47 : vector<8x128xf32>
    %49 = arith.negf %48 : vector<8x128xf32>
    %50 = math.exp %49 : vector<8x128xf32>
    %cst_31 = arith.constant 1.000000e+00 : f32
    %51 = vector.broadcast %cst_31 : f32 to vector<8x128xf32>
    %52 = arith.addf %51, %50 : vector<8x128xf32>
    %53 = arith.divf %51, %52 : vector<8x128xf32>
    %54 = math.tanh %48 : vector<8x128xf32>
    %55 = vector.extract_strided_slice %53 {offsets = [0, 0], sizes = [8, 32], strides = [1, 1]} : vector<8x128xf32> to vector<8x32xf32>
    %56 = vector.extract_strided_slice %53 {offsets = [0, 32], sizes = [8, 32], strides = [1, 1]} : vector<8x128xf32> to vector<8x32xf32>
    %57 = vector.extract_strided_slice %54 {offsets = [0, 64], sizes = [8, 32], strides = [1, 1]} : vector<8x128xf32> to vector<8x32xf32>
    %58 = vector.extract_strided_slice %53 {offsets = [0, 96], sizes = [8, 32], strides = [1, 1]} : vector<8x128xf32> to vector<8x32xf32>
    %59 = arith.mulf %56, %42 : vector<8x32xf32>
    %60 = arith.mulf %55, %57 : vector<8x32xf32>
    %61 = arith.addf %59, %60 : vector<8x32xf32>
    %62 = math.tanh %61 : vector<8x32xf32>
    %63 = arith.mulf %58, %62 : vector<8x32xf32>
    %c1_32 = arith.constant 1 : index
    %c0_33 = arith.constant 0 : index
    %c0_34 = arith.constant 0 : index
    %64 = vector.load %arg11[%c1_32, %c0_33, %c0_34] : memref<2x8x32xf32, #tpu.memory_space<vmem>>, vector<1x8x32xf32>
    %65 = vector.shape_cast %64 : vector<1x8x32xf32> to vector<8x32xf32>
    %66 = vector.shape_cast %63 : vector<8x32xf32> to vector<1x8x32xf32>
    tpu.vector_store %arg11[%c1_32, %c0_33, %c0_34], %66 {strides = array<i32>} : memref<2x8x32xf32, #tpu.memory_space<vmem>>, vector<1x8x32xf32>,
    %c1_35 = arith.constant 1 : index
    %c0_36 = arith.constant 0 : index
    %c0_37 = arith.constant 0 : index
    %67 = vector.load %arg12[%c1_35, %c0_36, %c0_37] : memref<2x8x32xf32, #tpu.memory_space<vmem>>, vector<1x8x32xf32>
    %68 = vector.shape_cast %67 : vector<1x8x32xf32> to vector<8x32xf32>
    %69 = vector.shape_cast %61 : vector<8x32xf32> to vector<1x8x32xf32>
    tpu.vector_store %arg12[%c1_35, %c0_36, %c0_37], %69 {strides = array<i32>} : memref<2x8x32xf32, #tpu.memory_space<vmem>>, vector<1x8x32xf32>,
    %c0_38 = arith.constant 0 : index
    %c0_39 = arith.constant 0 : index
    %70 = vector.load %arg6[%c0_38, %c0_39] : memref<32x128xf32, #tpu.memory_space<vmem>>, vector<32x128xf32>
    %cst_40 = arith.constant dense<0.000000e+00> : vector<8x128xf32>
    %71 = tpu.matmul %63, %70, %cst_40 {dimension_numbers = #tpu.dot_dimension_numbers<[1], [0], [0], [1], [0, 0, 1, 1], [], []>} : vector<8x32xf32>, vector<32x128xf32>, vector<8x128xf32> -> vector<8x128xf32>
    %c0_41 = arith.constant 0 : index
    %c0_42 = arith.constant 0 : index
    %72 = vector.load %arg7[%c0_41, %c0_42] : memref<1x128xf32, #tpu.memory_space<vmem>>, vector<1x128xf32>
    %73 = vector.broadcast %72 : vector<1x128xf32> to vector<8x128xf32>
    %74 = arith.addf %71, %73 : vector<8x128xf32>
    %c0_43 = arith.constant 0 : index
    %c0_44 = arith.constant 0 : index
    %75 = vector.load %arg10[%c0_43, %c0_44] : memref<8x128xf32, #tpu.memory_space<vmem>>, vector<8x128xf32>
    tpu.vector_store %arg10[%c0_43, %c0_44], %74 {strides = array<i32>} : memref<8x128xf32, #tpu.memory_space<vmem>>, vector<8x128xf32>,
    return
  }
}

</mosaic_0001>

<bundles_post_ra>
// kernel: tpu_custom_call.1
= control target key start
LH: loop header
LB: loop body
LE: loop exit
PB: predicated region body
PF: predicated region fallthrough
CT: control target
= control target key end

     0   :  { %18 = vsyncpa [#allocation3], 0  ;;  %s1169_s0 = inlined_call_operand.vmem [shape: s32[8,1], index: 0, kind: input, shape index: {}]   ;;  %s1170_s1 = inlined_call_operand.hbm [shape: f32[16,32], index: 1, kind: input, shape index: {}]   ;;  %s1171_s2 = inlined_call_operand.hbm [shape: f32[64,128], index: 2, kind: input, shape index: {}]   ;;  %s1172_s3 = inlined_call_operand.hbm [shape: f32[64,128], index: 3, kind: input, shape index: {}]   ;;  %s1173_s4 = inlined_call_operand.vmem [shape: f32[1,128], index: 4, kind: input, shape index: {}]   ;;  %s1174_s5 = inlined_call_operand.vmem [shape: f32[1,128], index: 5, kind: input, shape index: {}]   ;;  %s1175_s6 = inlined_call_operand.hbm [shape: f32[32,128], index: 6, kind: input, shape index: {}]   ;;  %s1176_s7 = inlined_call_operand.vmem [shape: f32[1,128], index: 7, kind: input, shape index: {}]   ;;  %s1177_s8 = inlined_call_operand.vmem [shape: f32[2,8,32], index: 8, kind: input, shape index: {}]   ;;  %s1178_s9 = inlined_call_operand.vmem [shape: f32[2,8,32], index: 9, kind: input, shape index: {}]   ;;  %s1179_s10 = inlined_call_operand.hbm [shape: f32[8,128], index: 10, kind: output, shape index: {0}]   ;;  %s1180_s11 = inlined_call_operand.hbm [shape: f32[2,8,32], index: 11, kind: output, shape index: {1}]   ;;  %s1181_s12 = inlined_call_operand.hbm [shape: f32[2,8,32], index: 12, kind: output, shape index: {2}]  }
   0x1   :  { %19 = vsyncpa [#allocation6], 0 }
   0x2   :  { %20 = vsyncpa [#allocation9], 0 }
   0x3   :  { %21 = vsyncpa [#allocation4], 0 }
   0x4   :  { %22 = vsyncpa [#allocation12], 0  ;;  %s908_s21 = smov [#allocation5]   ;;  %s909_s23 = smov [#allocation2]  }
   0x5   :  { %s42_s22 = sshll.u32 %s908_s21, 4  ;;  %s30_s24 = sshll.u32 %s909_s23, 4  ;;  %s43_s22 = int_to_ptr.vmem [resolvable:$true] %s42_s22  ;;  %s989_s24 = int_to_ptr.vmem [resolvable:$true] %s30_s24 }
   0x6   :  { %s744_s27 = scalar_lea.hbm %s1171_s2, 1024 }
   0x7   :  { %p745_p0 = scmp.ne.s32.totalorder %s1171_s2, %s744_s27  ;;  %p748_p1 = scmp.lt.u32.totalorder %s744_s27, %s1171_s2 }
   0x9   :  { %p750_p2 = pnand %p748_p1, %p745_p0 }
   0xb   :  { %753 = shalt.err (!%p750_p2)
}
   0xc   :  { %s754_s14 = scalar_lea.vmem %s43_s22, 1024  ;;  %p759_p4 = scmp.lt.s32.totalorder %s43_s22, %s43_s22 }
   0xd   :  { %p755_p3 = scmp.ne.s32.totalorder %s43_s22, %s754_s14  ;;  %p760_p5 = scmp.lt.s32.totalorder %s754_s14, %s754_s14 }
   0xf   :  { %p761_p6 = por %p760_p5, %p759_p4 }
  0x11   :  { %p762_p7 = pnand %p761_p6, %p755_p3 }
  0x13   :  { %765 = shalt.err (!%p762_p7)
}
  0x14   :  { %s910_s15 = smov 128   ;;  %s911_s16 = smov 8  }
  0x15   :  { %48 = dma.hbm_to_vmem [thread:$0]  %s1171_s2, 1024, %s43_s22, [#allocation6], %s910_s15, %s910_s15, %s911_s16  }
  0x16   :  { %s766_s21 = scalar_lea.hbm %s1170_s1, 256 }
  0x17   :  { %p767_p8 = scmp.ne.s32.totalorder %s1170_s1, %s766_s21  ;;  %p770_p9 = scmp.lt.u32.totalorder %s766_s21, %s1170_s1 }
  0x19   :  { %p772_p10 = pnand %p770_p9, %p767_p8 }
  0x1b   :  { %775 = shalt.err (!%p772_p10)
}
  0x1c   :  { %s776_s28 = scalar_lea.vmem %s989_s24, 256  ;;  %p781_p12 = scmp.lt.s32.totalorder %s989_s24, %s989_s24 }
  0x1d   :  { %p777_p11 = scmp.ne.s32.totalorder %s989_s24, %s776_s28  ;;  %p782_p13 = scmp.lt.s32.totalorder %s776_s28, %s776_s28 }
  0x1f   :  { %p783_p0 = por %p782_p13, %p781_p12 }
  0x21   :  { %p784_p1 = pnand %p783_p0, %p777_p11 }
  0x23   :  { %787 = shalt.err (!%p784_p1)
}
  0x24   :  { %36 = dma.hbm_to_vmem [thread:$0]  %s1170_s1, 256, %s989_s24, [#allocation3], %s910_s15, %s910_s15, %s911_s16  }
  0x25   :  { %s912_s29 = smov [#allocation7]   ;;  %s913_s13 = smov [#allocation8]  }
  0x26   :  { %s54_s30 = sshll.u32 %s912_s29, 4  ;;  %s70_s14 = sshll.u32 %s913_s13, 4  ;;  %s55_s30 = int_to_ptr.vmem [resolvable:$true] %s54_s30  ;;  %s1026_s14 = int_to_ptr.vmem [resolvable:$true] %s70_s14 }
  0x27   :  { %s788_s19 = scalar_lea.hbm %s1172_s3, 1024 }
  0x28   :  { %p789_p2 = scmp.ne.s32.totalorder %s1172_s3, %s788_s19  ;;  %p792_p3 = scmp.lt.u32.totalorder %s788_s19, %s1172_s3 }
  0x2a   :  { %p794_p4 = pnand %p792_p3, %p789_p2 }
  0x2c   :  { %797 = shalt.err (!%p794_p4)
}
  0x2d   :  { %s798_s1 = scalar_lea.vmem %s55_s30, 1024  ;;  %p803_p6 = scmp.lt.s32.totalorder %s55_s30, %s55_s30 }
  0x2e   :  { %p799_p5 = scmp.ne.s32.totalorder %s55_s30, %s798_s1  ;;  %p804_p7 = scmp.lt.s32.totalorder %s798_s1, %s798_s1 }
  0x30   :  { %p805_p8 = por %p804_p7, %p803_p6 }
  0x32   :  { %p806_p9 = pnand %p805_p8, %p799_p5 }
  0x34   :  { %809 = shalt.err (!%p806_p9)
}
  0x35   :  { %60 = dma.hbm_to_vmem [thread:$0]  %s1172_s3, 1024, %s55_s30, [#allocation6], %s910_s15, %s910_s15, %s911_s16  }
  0x36   :  { %s810_s2 = scalar_lea.hbm %s1175_s6, 512 }
  0x37   :  { %p811_p10 = scmp.ne.s32.totalorder %s1175_s6, %s810_s2  ;;  %p814_p11 = scmp.lt.u32.totalorder %s810_s2, %s1175_s6 }
  0x39   :  { %p816_p12 = pnand %p814_p11, %p811_p10 }
  0x3b   :  { %819 = shalt.err (!%p816_p12)
}
  0x3c   :  { %s820_s18 = scalar_lea.vmem %s1026_s14, 512  ;;  %p825_p0 = scmp.lt.s32.totalorder %s1026_s14, %s1026_s14 }
  0x3d   :  { %p821_p13 = scmp.ne.s32.totalorder %s1026_s14, %s820_s18  ;;  %p826_p1 = scmp.lt.s32.totalorder %s820_s18, %s820_s18 }
  0x3f   :  { %p827_p2 = por %p826_p1, %p825_p0 }
  0x41   :  { %p828_p3 = pnand %p827_p2, %p821_p13 }
  0x43   :  { %831 = shalt.err (!%p828_p3)
}
  0x44   :  { %76 = dma.hbm_to_vmem [thread:$0]  %s1175_s6, 512, %s1026_s14, [#allocation9], %s910_s15, %s910_s15, %s911_s16  }
  0x45   :  { %898 = dma.done.wait [#allocation3], 256  }
  0x46   :  { %899 = vsyncadd [#allocation3], 4294967040 }
  0x47   :  { %900 = dma.done.wait [#allocation6], 2048  }
  0x48   :  { %901 = vsyncadd [#allocation6], 4294965248 }
  0x49   :  { %902 = dma.done.wait [#allocation9], 512  }
  0x4a   :  { %903 = vsyncadd [#allocation9], 4294966784  ;;  %v914_v0 = vmov 0   ;;  %v915_v1 = vmov 0.0|0.0   ;;  %v95_v2 = vld [vmem:[%s1169_s0] sm:$0xff]  ;;  %v105_v4 = vld [vmem:[#allocation2 + $0x8] sm:$0xff]  ;;  %v96_v20 = vlaneseq }
  0x4b   :  { %727 = vset.pattern.permute.xlu0 %v914_v0  ;;  %678 = vmatprep.subr.bf16.mxu0 %v915_v1  ;;  %v104_v3 = vld [vmem:[#allocation2] sm:$0xff]  ;;  %vm916_vm0 = vmmov 0   ;;  %v917_v6 = vmov 0.0   ;;  %v188_v8 = vld [vmem:[#allocation5] sm:$0xff]  ;;  %v189_v9 = vld [vmem:[#allocation5 + $0x8] sm:$0xff]  ;;  %s918_s0 = smov 32  }
  0x4c   :  { %681 = vmatprep.subr.bf16.mxu1 %v915_v1  ;;  %99 = vperm.xlu0 %727, %v95_v2   ;;  %v679_v5 = vpack.c.bf16 %v105_v4, %v104_v3  ;;  %v180_v7 = vld [vmem:[%s1177_s8] sm:$0xff]  ;;  %v682_v10 = vpack.c.bf16 %v189_v9, %v188_v8  ;;  %v191_v12 = vld [vmem:[#allocation5 + $0x18] sm:$0xff]  ;;  %v192_v14 = vld [vmem:[#allocation5 + $0x20] sm:$0xff]  ;;  %v97_v21 = vand.u32 127, %v96_v20  ;;  %vm106_vm1 = vcmask 130048   ;;  %s919_s25 = smov 64  }
  0x4d   :  { %626 = vmatprep.mubr.msk.f32.mxu0 %vm916_vm0, %v917_v6  ;;  %645 = vmatprep.mubr.msk.f32.mxu1 %vm916_vm0, %v917_v6  ;;  %v190_v11 = vld [vmem:[#allocation5 + $0x10] sm:$0xff]  ;;  %v193_v15 = vld [vmem:[#allocation5 + $0x28] sm:$0xff]  ;;  %v195_v18 = vld [vmem:[#allocation5 + $0x38] sm:$0xff]  ;;  %vm186_vm3 = vcmask 261120   ;;  %vm203_vm4 = vcmask 523264  }
  0x4e   :  { %680 = vmatpush3.bf16.msra.mxu0 %v679_v5  ;;  %683 = vmatpush3.bf16.msra.mxu1 %v682_v10  ;;  %v685_v13 = vpack.c.bf16 %v191_v12, %v190_v11  ;;  %v688_v16 = vpack.c.bf16 %v193_v15, %v192_v14  ;;  %v194_v17 = vld [vmem:[#allocation5 + $0x30] sm:$0xff]  ;;  %v324_v44 = vld [vmem:[#allocation7] sm:$0xff]  ;;  %v325_v45 = vld [vmem:[#allocation7 + $0x8] sm:$0xff] }
  0x4f   :  { %693 = vmatprep.subr.bf16.mxu0 %v915_v1  ;;  %684 = vmatprep.subr.bf16.mxu1 %v915_v1  ;;  %v691_v19 = vpack.c.bf16 %v195_v18, %v194_v17  ;;  %v586_v28 = vld [vmem:[%s1173_s4] ss:$0 sm:$0xff]  ;;  %v694_v47 = vpack.c.bf16 %v325_v45, %v324_v44  ;;  %v327_v48 = vld [vmem:[#allocation7 + $0x18] sm:$0xff]  ;;  %v328_v50 = vld [vmem:[#allocation7 + $0x20] sm:$0xff] }
  0x50   :  { %183 = vrot.lane.b32.xlu0 %v180_v7, %s918_s0  ;;  %v181_v33 = vld [vmem:[%s1178_s9] sm:$0xff]  ;;  %v329_v51 = vld [vmem:[#allocation7 + $0x28] sm:$0xff]  ;;  %v331_v54 = vld [vmem:[#allocation7 + $0x38] sm:$0xff] }
  0x51   :  { %v326_v46 = vld [vmem:[#allocation7 + $0x10] sm:$0xff]  ;;  %v700_v52 = vpack.c.bf16 %v329_v51, %v328_v50  ;;  %v589_v57 = vld [vmem:[%s1177_s8 + $0x8] sm:$0xff]  ;;  %v453_v17 = vld [vmem:[#allocation8 + $0x8] sm:$0xff] }
  0x52   :  { %686 = vmatpush3.bf16.msra.mxu1 %v685_v13  ;;  %v697_v49 = vpack.c.bf16 %v327_v48, %v326_v46  ;;  %v330_v53 = vld [vmem:[#allocation7 + $0x30] sm:$0xff]  ;;  %v590_v58 = vld [vmem:[%s1178_s9 + $0x8] sm:$0xff]  ;;  %s921_s9 = smov [#allocation11]  }
  0x53   :  { %687 = vmatprep.subr.bf16.mxu1 %v915_v1  ;;  %v703_v56 = vpack.c.bf16 %v331_v54, %v330_v53  ;;  %v591_v0 = vld [vmem:[%s1174_s5] ss:$0 sm:$0xff]  ;;  %v455_v20 = vld [vmem:[#allocation8 + $0x18] sm:$0xff]  ;;  %s920_s5 = smov 96   ;;  %s551_s22 = sshll.u32 %s921_s9, 4  ;;  %s552_s22 = int_to_ptr.vmem [resolvable:$true] %s551_s22 }
  0x54   :  { %v454_v18 = vld [vmem:[#allocation8 + $0x10] sm:$0xff]  ;;  %s832_s29 = scalar_lea.vmem %s552_s22, 256  ;;  %p837_p5 = scmp.lt.s32.totalorder %s552_s22, %s552_s22 }
  0x55   :  { %p833_p4 = scmp.ne.s32.totalorder %s552_s22, %s832_s29  ;;  %p838_p6 = scmp.lt.s32.totalorder %s832_s29, %s832_s29 }
  0x56   :  { %689 = vmatpush3.bf16.msra.mxu1 %v688_v16  ;;  %v452_v16 = vld [vmem:[#allocation8] sm:$0xff] }
  0x57   :  { %690 = vmatprep.subr.bf16.mxu1 %v915_v1  ;;  %p839_p7 = por %p838_p6, %p837_p5 }
  0x59   :  { %p840_p8 = pnand %p839_p7, %p833_p4 }
  0x5a   :  { %692 = vmatpush3.bf16.msra.mxu1 %v691_v19  ;;  %v706_v19 = vpack.c.bf16 %v453_v17, %v452_v16 }
  0x5b   :  { %705 = vmatprep.subr.bf16.mxu1 %v915_v1 }
  0xcb   :  { %v100_v22 = vpop.permute.xlu0 %99 }
  0xcc   :  { %vm101_vm2 = vcmp.eq.s32.totalorder %v100_v22, %v97_v21  ;;  %v709_v21 = vpack.c.bf16 %v455_v20, %v454_v18 }
  0xcd   :  { %v584_v23 = vsel %vm101_vm2, 1.0, %v917_v6 }
  0xce   :  { %627 = vmatmul.mubr.msk.f32.vlgmr.msra.gmra.mrb[0].mxu0 %vm106_vm1, %v584_v23 }
  0xcf   :  { %664 = vmatprep.mubr.msk.f32.mxu0 %vm916_vm0, %v917_v6  ;;  %v184_v24 = vpop.permute.xlu0 %183  ;;  %695 = vmatpush3.bf16.msra.mxu0 %v694_v47 }
  0xd0   :  { %696 = vmatprep.subr.bf16.mxu0 %v915_v1 }
  0xd3   :  { %698 = vmatpush3.bf16.msra.mxu0 %v697_v49 }
  0xd4   :  { %699 = vmatprep.subr.bf16.mxu0 %v915_v1 }
  0xd7   :  { %701 = vmatpush3.bf16.msra.mxu0 %v700_v52 }
  0xd8   :  { %702 = vmatprep.subr.bf16.mxu0 %v915_v1 }
  0xdb   :  { %704 = vmatpush3.bf16.msra.mxu0 %v703_v56 }
 0x1a1   :  { %v176_v25 = vpop.f32.mrb[0].mxu0 }
 0x1a2   :  { %v187_v26 = vsel %vm186_vm3, %v176_v25, %v184_v24  ;;  %v628_v27 = vpop.f32.mrb[1].mxu0 }
 0x1a3   :  { %646 = vmatmul.mubr.msk.f32.vlgmr.msra.gmra.mrb[0].mxu1 %vm203_vm4, %v187_v26 }
 0x1a4   :  { %675 = vmatprep.mubr.msk.f32.mxu1 %vm916_vm0, %v917_v6  ;;  %707 = vmatpush3.bf16.msra.mxu1 %v706_v19 }
 0x1a5   :  { %708 = vmatprep.subr.bf16.mxu1 %v915_v1 }
 0x1a8   :  { %710 = vmatpush3.bf16.msra.mxu1 %v709_v21 }
 0x276   :  { %v273_v29 = vpop.f32.mrb[0].mxu1 }
 0x277   :  { %v274_v30 = vadd.f32 %v586_v28, %v273_v29  ;;  %v647_v31 = vpop.f32.mrb[1].mxu1 }
 0x279   :  { %728 = vtanh.f32 %v274_v30  ;;  %v588_v34 = vmul.f32 -1.442695, %v274_v30 }
 0x27b   :  { %730 = vpow2.f32 %v588_v34 }
 0x283   :  { %v729_v32 = vpop.eup %728 }
 0x284   :  { %290 = vrot.lane.b32.xlu1 %v729_v32, %s919_s25 }
 0x285   :  { %v731_v35 = vpop.eup %730 }
 0x286   :  { %v280_v36 = vadd.f32 1.0, %v731_v35 }
 0x288   :  { %285 = vrot.lane.b32.xlu1 %v181_v33, %s918_s0  ;;  %732 = vrcp.f32 %v280_v36 }
 0x292   :  { %v733_v37 = vpop.eup %732 }
 0x2f6   :  { %v291_v38 = vpop.permute.xlu1 %290 }
 0x2f7   :  { %v293_v39 = vmul.f32 %v733_v37, %v291_v38 }
 0x2f9   :  { %295 = vrot.lane.b32.xlu0 %v293_v39, %s918_s0 }
 0x2fa   :  { %v286_v40 = vpop.permute.xlu1 %285 }
 0x2fb   :  { %v288_v41 = vmul.f32 %v733_v37, %v286_v40 }
 0x36b   :  { %v296_v42 = vpop.permute.xlu0 %295 }
 0x36c   :  { %v1092_v43 = vadd.f32 %v296_v42, %v288_v41 }
 0x36e   :  { %734 = vtanh.f32 %v1092_v43 }
 0x378   :  { %v735_v55 = vpop.eup %734 }
 0x379   :  { %301 = vrot.lane.b32.xlu1 %v735_v55, %s919_s25 }
 0x37d   :  { %320 = vrot.lane.b32.xlu1 %v589_v57, %s918_s0 }
 0x381   :  { %420 = vrot.lane.b32.xlu1 %v590_v58, %s918_s0 }
 0x3eb   :  { %v302_v59 = vpop.permute.xlu1 %301 }
 0x3ec   :  { %v304_v60 = vmul.f32 %v733_v37, %v302_v59 }
 0x3ee   :  { %306 = vrot.lane.b32.xlu0 %v304_v60, %s918_s0 }
 0x3ef   :  { %v321_v61 = vpop.permute.xlu1 %320 }
 0x3f3   :  { %v421_v12 = vpop.permute.xlu1 %420 }
 0x460   :  { %v307_v62 = vpop.permute.xlu0 %306 }
 0x461   :  { %309 = vst.msk [vmem:[#allocation11] sm:$0xff] %vm186_vm3, %v307_v62  ;;  %v323_v63 = vsel %vm186_vm3, %v307_v62, %v321_v61 }
 0x462   :  { %665 = vmatmul.mubr.msk.f32.vlgmr.msra.gmra.mrb[2].mxu0 %vm203_vm4, %v323_v63 }
 0x535   :  { %v408_v2 = vpop.f32.mrb[2].mxu0 }
 0x536   :  { %v409_v3 = vadd.f32 %v591_v0, %v408_v2  ;;  %v666_v4 = vpop.f32.mrb[3].mxu0 }
 0x538   :  { %736 = vtanh.f32 %v409_v3  ;;  %v593_v6 = vmul.f32 -1.442695, %v409_v3 }
 0x53a   :  { %738 = vpow2.f32 %v593_v6 }
 0x542   :  { %v737_v5 = vpop.eup %736 }
 0x543   :  { %425 = vrot.lane.b32.xlu0 %v737_v5, %s919_s25 }
 0x544   :  { %v739_v7 = vpop.eup %738 }
 0x545   :  { %v415_v8 = vadd.f32 1.0, %v739_v7 }
 0x547   :  { %740 = vrcp.f32 %v415_v8 }
 0x551   :  { %v741_v9 = vpop.eup %740 }
 0x552   :  { %v423_v13 = vmul.f32 %v741_v9, %v421_v12 }
 0x5b5   :  { %v426_v10 = vpop.permute.xlu0 %425 }
 0x5b6   :  { %v428_v11 = vmul.f32 %v741_v9, %v426_v10 }
 0x5b8   :  { %430 = vrot.lane.b32.xlu0 %v428_v11, %s918_s0 }
 0x62a   :  { %v431_v14 = vpop.permute.xlu0 %430 }
 0x62b   :  { %v433_v15 = vadd.f32 %v431_v14, %v423_v13 }
 0x62d   :  { %742 = vtanh.f32 %v433_v15 }
 0x637   :  { %v743_v22 = vpop.eup %742 }
 0x638   :  { %436 = vrot.lane.b32.xlu1 %v743_v22, %s919_s25 }
 0x63c   :  { %311 = vrot.lane.b32.xlu1 %v1092_v43, %s920_s5 }
 0x6aa   :  { %v437_v23 = vpop.permute.xlu1 %436 }
 0x6ab   :  { %v439_v24 = vmul.f32 %v741_v9, %v437_v23 }
 0x6ad   :  { %441 = vrot.lane.b32.xlu0 %v439_v24, %s918_s0 }
 0x6ae   :  { %v312_v25 = vpop.permute.xlu1 %311 }
 0x6af   :  { %314 = vst.msk [vmem:[#allocation13] sm:$0xff] %vm186_vm3, %v312_v25 }
 0x6b1   :  { %447 = vrot.lane.b32.xlu0 %v433_v15, %s920_s5 }
 0x71f   :  { %v442_v26 = vpop.permute.xlu0 %441 }
 0x720   :  { %445 = vst.msk [vmem:[#allocation11 + $0x8] sm:$0xff] %vm186_vm3, %v442_v26  ;;  %676 = vmatmul.mubr.msk.f32.vlgmr.msra.gmra.mrb[2].mxu1 %vm186_vm3, %v442_v26 }
 0x723   :  { %v448_v1 = vpop.permute.xlu0 %447 }
 0x724   :  { %451 = vst.msk [vmem:[#allocation13 + $0x8] sm:$0xff] %vm186_vm3, %v448_v1 }
 0x725   :  { %843 = shalt.err (!%p840_p8)
}
 0x726   :  { %s844_s18 = scalar_lea.hbm %s1180_s11, 256 }
 0x727   :  { %p845_p9 = scmp.ne.s32.totalorder %s1180_s11, %s844_s18  ;;  %p848_p10 = scmp.lt.u32.totalorder %s844_s18, %s1180_s11 }
 0x729   :  { %p850_p11 = pnand %p848_p10, %p845_p9 }
 0x72b   :  { %853 = shalt.err (!%p850_p11)
}
 0x72c   :  { %557 = dma.vmem_to_hbm [thread:$0]  %s552_s22, 256, %s1180_s11, [#allocation12], %s910_s15, %s910_s15, %s911_s16  }
 0x72d   :  { %s922_s0 = smov [#allocation13]  }
 0x72e   :  { %s563_s21 = sshll.u32 %s922_s0, 4  ;;  %s564_s21 = int_to_ptr.vmem [resolvable:$true] %s563_s21 }
 0x72f   :  { %s854_s23 = scalar_lea.vmem %s564_s21, 256  ;;  %p859_p13 = scmp.lt.s32.totalorder %s564_s21, %s564_s21 }
 0x730   :  { %p855_p12 = scmp.ne.s32.totalorder %s564_s21, %s854_s23  ;;  %p860_p0 = scmp.lt.s32.totalorder %s854_s23, %s854_s23 }
 0x732   :  { %p861_p1 = por %p860_p0, %p859_p13 }
 0x734   :  { %p862_p2 = pnand %p861_p1, %p855_p12 }
 0x736   :  { %865 = shalt.err (!%p862_p2)
}
 0x737   :  { %s866_s24 = scalar_lea.hbm %s1181_s12, 256 }
 0x738   :  { %p867_p3 = scmp.ne.s32.totalorder %s1181_s12, %s866_s24  ;;  %p870_p4 = scmp.lt.u32.totalorder %s866_s24, %s1181_s12 }
 0x73a   :  { %p872_p5 = pnand %p870_p4, %p867_p3 }
 0x73c   :  { %875 = shalt.err (!%p872_p5)
}
 0x73d   :  { %569 = dma.vmem_to_hbm [thread:$0]  %s564_s21, 256, %s1181_s12, [#allocation12], %s910_s15, %s910_s15, %s911_s16  }
 0x73e   :  { %v594_v27 = vld [vmem:[%s1176_s7] ss:$0 sm:$0xff]  ;;  %s923_s9 = smov [#allocation10]  }
 0x73f   :  { %s542_s22 = sshll.u32 %s923_s9, 4  ;;  %s543_s22 = int_to_ptr.vmem [resolvable:$true] %s542_s22 }
 0x740   :  { %s876_s29 = scalar_lea.vmem %s543_s22, 128  ;;  %p881_p7 = scmp.lt.s32.totalorder %s543_s22, %s543_s22 }
 0x741   :  { %p877_p6 = scmp.ne.s32.totalorder %s543_s22, %s876_s29  ;;  %p882_p8 = scmp.lt.s32.totalorder %s876_s29, %s876_s29 }
 0x743   :  { %p883_p9 = por %p882_p8, %p881_p7 }
 0x745   :  { %p884_p10 = pnand %p883_p9, %p877_p6 }
 0x7f3   :  { %v531_v28 = vpop.f32.mrb[2].mxu1 }
 0x7f4   :  { %v532_v29 = vadd.f32 %v594_v27, %v531_v28  ;;  %v677_v30 = vpop.f32.mrb[3].mxu1 }
 0x7f6   :  { %535 = vst [vmem:[#allocation10] sm:$0xff] %v532_v29 }
 0x7f7   :  { %887 = shalt.err (!%p884_p10)
}
 0x7f8   :  { %s888_s15 = scalar_lea.hbm %s1179_s10, 128 }
 0x7f9   :  { %p889_p11 = scmp.ne.s32.totalorder %s1179_s10, %s888_s15  ;;  %p892_p12 = scmp.lt.u32.totalorder %s888_s15, %s1179_s10 }
 0x7fb   :  { %p894_p13 = pnand %p892_p12, %p889_p11 }
 0x7fd   :  { %897 = shalt.err (!%p894_p13)
}
 0x7fe   :  { %545 = dma.vmem_to_hbm [thread:$0]  %s543_s22, 128, %s1179_s10, [#allocation4]  }
 0x7ff   :  { %904 = dma.done.wait [#allocation4], 128  }
 0x800   :  { %905 = vsyncadd [#allocation4], 4294967168 }
 0x801   :  { %906 = dma.done.wait [#allocation12], 512  }
 0x802   :  { %907 = vsyncadd [#allocation12], 4294966784 }
 0x803   :  { %579 = vsyncpa [#allocation3], 1 }
 0x804   :  { %580 = vsyncpa [#allocation6], 1 }
 0x805   :  { %581 = vsyncpa [#allocation9], 1 }
 0x806   :  { %582 = vsyncpa [#allocation4], 1 }
 0x807   :  { %583 = vsyncpa [#allocation12], 1 }

</bundles_post_ra>
